<compile_context>
chip_gen: v7x
topology: tpu7x:2x2x1
jax: 0.10.0
libtpu: 0.0.40
codegen_flags: <defaults>
</compile_context>

<pallas_src>
import functools

import jax
import jax.numpy as jnp
from jax.experimental import pallas as pl
from jax.experimental.pallas import tpu as pltpu

_LANE = 128


def _round_up(v, m):
    return ((v + m - 1) // m) * m


def _pick_tile(dim, candidates=(512, 256, 128)):
    for c in candidates:
        if dim % c == 0:
            return c
    return dim  # unreachable: dims are padded to multiples of 128


def _pad2d(x, rows, cols):
    r, c = x.shape
    if r == rows and c == cols:
        return x
    return jnp.pad(x, ((0, rows - r), (0, cols - c)))


def _gemm_bias_act_kernel(a_ref, b_ref, bias_ref, o_ref, acc_ref, *, apply_relu):
    """One (tm, tn) output tile of A @ B + bias (optional relu), k-reduction on axis 2."""
    k = pl.program_id(2)

    @pl.when(k == 0)
    def _init():
        acc_ref[...] = jnp.zeros_like(acc_ref)

    acc_ref[...] += jnp.dot(a_ref[...], b_ref[...],
                            preferred_element_type=jnp.float32)

    @pl.when(k == pl.num_programs(2) - 1)
    def _finalize():
        out = acc_ref[...] + bias_ref[...]           # f32 epilogue (v5e-safe)
        if apply_relu:
            out = jnp.maximum(out, 0.0)
        o_ref[...] = out.astype(o_ref.dtype)


def _matmul_bias_act(a, b, bias, *, apply_relu, out_dtype):
    """Tiled GEMM: a (M,K) @ b (K,N) + bias (1,N), optional relu. All dims % 128 == 0."""
    m, k_dim = a.shape
    k2, n = b.shape
    assert k_dim == k2 and bias.shape == (1, n)

    tm = _pick_tile(m)
    tn = _pick_tile(n)
    tk = _pick_tile(k_dim)
    grid = (m // tm, n // tn, k_dim // tk)

    kernel = functools.partial(_gemm_bias_act_kernel, apply_relu=apply_relu)

    return pl.pallas_call(
        kernel,
        out_shape=jax.ShapeDtypeStruct((m, n), out_dtype),
        grid_spec=pltpu.PrefetchScalarGridSpec(
            num_scalar_prefetch=0,
            grid=grid,
            in_specs=[
                pl.BlockSpec((tm, tk), lambda i, j, k: (i, k)),
                pl.BlockSpec((tk, tn), lambda i, j, k: (k, j)),
                pl.BlockSpec((1, tn), lambda i, j, k: (0, j)),  # bias stays resident per j
            ],
            out_specs=pl.BlockSpec((tm, tn), lambda i, j, k: (i, j)),
            scratch_shapes=[pltpu.VMEM((tm, tn), jnp.float32)],
        ),
        compiler_params=pltpu.CompilerParams(
            dimension_semantics=("parallel", "parallel", "arbitrary")),
    )(a, b, bias)


def gcn_forward(x, adj, w1, b1, w2, b2):
    """out = adj @ (relu(adj @ (x @ w1) + b1) @ w2) + b2   (dropout = identity, eval mode)."""
    n_nodes, nfeat = x.shape
    nhid = w1.shape[1]
    nclass = w2.shape[1]

    np_ = _round_up(n_nodes, _LANE)
    fp_ = _round_up(nfeat, _LANE)
    hp_ = _round_up(nhid, _LANE)
    cp_ = _round_up(nclass, _LANE)

    bf16 = jnp.bfloat16
    x_p = _pad2d(x, np_, fp_).astype(bf16)
    adj_p = _pad2d(adj, np_, np_).astype(bf16)     # adj dominates bytes -> bf16 halves HBM traffic
    w1_p = _pad2d(w1, fp_, hp_).astype(bf16)
    w2_p = _pad2d(w2, hp_, cp_).astype(bf16)
    b1_p = _pad2d(b1, 1, hp_).astype(jnp.float32)
    b2_p = _pad2d(b2, 1, cp_).astype(jnp.float32)
    zero_h = jnp.zeros((1, hp_), jnp.float32)
    zero_c = jnp.zeros((1, cp_), jnp.float32)

    # ---- layer 1 ----
    s1 = _matmul_bias_act(x_p, w1_p, zero_h, apply_relu=False, out_dtype=bf16)
    h1 = _matmul_bias_act(adj_p, s1, b1_p, apply_relu=True, out_dtype=bf16)

    # ---- dropout (inference mode => identity) ----

    # ---- layer 2 ----
    s2 = _matmul_bias_act(h1, w2_p, zero_c, apply_relu=False, out_dtype=bf16)
    out = _matmul_bias_act(adj_p, s2, b2_p, apply_relu=False, out_dtype=jnp.float32)

    return out[:n_nodes, :nclass]


def init_params(key, nfeat, nhid, nclass):
    # GraphConvolution init: uniform(-stdv, stdv) with stdv = 1/sqrt(fan_out)
    k1, k2, k3, k4 = jax.random.split(key, 4)
    stdv1 = 1.0 / jnp.sqrt(jnp.float32(nhid))
    stdv2 = 1.0 / jnp.sqrt(jnp.float32(nclass))
    w1 = jax.random.uniform(k1, (nfeat, nhid), jnp.float32, -stdv1, stdv1)
    b1 = jax.random.uniform(k2, (1, nhid), jnp.float32, -stdv1, stdv1)
    w2 = jax.random.uniform(k3, (nhid, nclass), jnp.float32, -stdv2, stdv2)
    b2 = jax.random.uniform(k4, (1, nclass), jnp.float32, -stdv2, stdv2)
    # nn.Linear(nclass, 1) exists in __init__ but is unused in forward -> omitted.
    return w1, b1, w2, b2


def _ref_gcn_bf16(x, adj, w1, b1, w2, b2):
    """Pure-JAX reference mirroring the kernel's bf16-operand / f32-accumulate scheme."""
    bf = jnp.bfloat16
    f32 = jnp.float32
    s1 = jnp.dot(x.astype(bf), w1.astype(bf), preferred_element_type=f32).astype(bf)
    h1 = jnp.maximum(jnp.dot(adj.astype(bf), s1, preferred_element_type=f32) + b1, 0.0).astype(bf)
    s2 = jnp.dot(h1, w2.astype(bf), preferred_element_type=f32).astype(bf)
    return jnp.dot(adj.astype(bf), s2, preferred_element_type=f32) + b2


if __name__ == "__main__":
    key = jax.random.PRNGKey(0)
    N, nfeat, nhid, nclass = 8, 16, 32, 4

    kx, kadj, kp = jax.random.split(key, 3)
    x = jax.random.normal(kx, (N, nfeat), jnp.float32)

    # symmetric, row-normalized-ish dense adjacency (synthetic)
    a = jax.random.uniform(kadj, (N, N), jnp.float32)
    adj = (a + a.T) * 0.5 + jnp.eye(N, dtype=jnp.float32)
    adj = adj / jnp.sum(adj, axis=1, keepdims=True)

    w1, b1, w2, b2 = init_params(kp, nfeat, nhid, nclass)

    out = gcn_forward(x, adj, w1, b1, w2, b2)
    out = jax.block_until_ready(out)
    assert out.shape == (N, nclass)

    # strict check against a reference using the same bf16-operand scheme
    ref_bf = _ref_gcn_bf16(x, adj, w1, b1, w2, b2)
    assert jnp.allclose(out, ref_bf, atol=2e-3, rtol=2e-3), \
        f"max abs err vs bf16 ref: {jnp.max(jnp.abs(out - ref_bf))}"

    # loose sanity check against the full-f32 math of the PyTorch module
    ref_f32 = adj @ (jnp.maximum(adj @ (x @ w1) + b1, 0.0) @ w2) + b2
    assert jnp.allclose(out, ref_f32, atol=5e-2, rtol=5e-2), \
        f"max abs err vs f32 ref: {jnp.max(jnp.abs(out - ref_f32))}"

    print("KERNEL_OK")
</pallas_src>

<mosaic_0001>
module attributes {stable_mosaic.version = 11 : i64} {
  func.func @_gemm_bias_act_kernel(%arg0: i32, %arg1: i32, %arg2: i32, %arg3: memref<128x128xbf16, #tpu.memory_space<vmem>>, %arg4: memref<128x128xbf16, #tpu.memory_space<vmem>>, %arg5: memref<1x128xf32, #tpu.memory_space<vmem>>, %arg6: memref<128x128xbf16, #tpu.memory_space<vmem>>, %arg7: memref<128x128xf32, #tpu.memory_space<vmem>>) attributes {dimension_semantics = [#tpu.dimension_semantics<parallel>, #tpu.dimension_semantics<parallel>, #tpu.dimension_semantics<arbitrary>], iteration_bounds = array<i64: 1, 1, 1>, scalar_prefetch = 0 : i64, scratch_operands = 1 : i64, tpu.core_type = #tpu.core_type<tc>, window_params = [{transform_indices = @transform_0, window_bounds = array<i64: 128, 128>}, {transform_indices = @transform_1, window_bounds = array<i64: 128, 128>}, {transform_indices = @transform_2, window_bounds = array<i64: 1, 128>}, {transform_indices = @transform_3, window_bounds = array<i64: 128, 128>}]} {
    %c0_i32 = arith.constant 0 : i32
    %0 = arith.cmpi eq, %arg2, %c0_i32 : i32
    %1 = arith.extui %0 : i1 to i32
    %c0_i32_0 = arith.constant 0 : i32
    %2 = arith.cmpi ne, %1, %c0_i32_0 : i32
    scf.if %2 {
      %cst_10 = arith.constant 0.000000e+00 : f32
      %12 = vector.broadcast %cst_10 : f32 to vector<128x128xf32>
      %c0_11 = arith.constant 0 : index
      %c0_12 = arith.constant 0 : index
      %13 = vector.load %arg7[%c0_11, %c0_12] : memref<128x128xf32, #tpu.memory_space<vmem>>, vector<128x128xf32>
      tpu.vector_store %arg7[%c0_11, %c0_12], %12 {strides = array<i32>} : memref<128x128xf32, #tpu.memory_space<vmem>>, vector<128x128xf32>,
    } else {
    }
    %c0 = arith.constant 0 : index
    %c0_1 = arith.constant 0 : index
    %3 = vector.load %arg7[%c0, %c0_1] : memref<128x128xf32, #tpu.memory_space<vmem>>, vector<128x128xf32>
    %c0_2 = arith.constant 0 : index
    %c0_3 = arith.constant 0 : index
    %4 = vector.load %arg3[%c0_2, %c0_3] : memref<128x128xbf16, #tpu.memory_space<vmem>>, vector<128x128xbf16>
    %c0_4 = arith.constant 0 : index
    %c0_5 = arith.constant 0 : index
    %5 = vector.load %arg4[%c0_4, %c0_5] : memref<128x128xbf16, #tpu.memory_space<vmem>>, vector<128x128xbf16>
    %cst = arith.constant dense<0.000000e+00> : vector<128x128xf32>
    %6 = tpu.matmul %4, %5, %cst {dimension_numbers = #tpu.dot_dimension_numbers<[1], [0], [0], [1], [0, 0, 1, 1], [], []>} : vector<128x128xbf16>, vector<128x128xbf16>, vector<128x128xf32> -> vector<128x128xf32>
    %7 = arith.addf %3, %6 : vector<128x128xf32>
    %c0_6 = arith.constant 0 : index
    %c0_7 = arith.constant 0 : index
    %8 = vector.load %arg7[%c0_6, %c0_7] : memref<128x128xf32, #tpu.memory_space<vmem>>, vector<128x128xf32>
    tpu.vector_store %arg7[%c0_6, %c0_7], %7 {strides = array<i32>} : memref<128x128xf32, #tpu.memory_space<vmem>>, vector<128x128xf32>,
    %c0_i32_8 = arith.constant 0 : i32
    %9 = arith.cmpi eq, %arg2, %c0_i32_8 : i32
    %10 = arith.extui %9 : i1 to i32
    %c0_i32_9 = arith.constant 0 : i32
    %11 = arith.cmpi ne, %10, %c0_i32_9 : i32
    scf.if %11 {
      %c0_10 = arith.constant 0 : index
      %c0_11 = arith.constant 0 : index
      %12 = vector.load %arg7[%c0_10, %c0_11] : memref<128x128xf32, #tpu.memory_space<vmem>>, vector<128x128xf32>
      %c0_12 = arith.constant 0 : index
      %c0_13 = arith.constant 0 : index
      %13 = vector.load %arg5[%c0_12, %c0_13] : memref<1x128xf32, #tpu.memory_space<vmem>>, vector<1x128xf32>
      %14 = vector.broadcast %13 : vector<1x128xf32> to vector<128x128xf32>
      %15 = arith.addf %12, %14 : vector<128x128xf32>
      %16 = arith.truncf %15 : vector<128x128xf32> to vector<128x128xbf16>
      %c0_14 = arith.constant 0 : index
      %c0_15 = arith.constant 0 : index
      %17 = vector.load %arg6[%c0_14, %c0_15] : memref<128x128xbf16, #tpu.memory_space<vmem>>, vector<128x128xbf16>
      tpu.vector_store %arg6[%c0_14, %c0_15], %16 {strides = array<i32>} : memref<128x128xbf16, #tpu.memory_space<vmem>>, vector<128x128xbf16>,
    } else {
    }
    return
  }
  func.func @transform_0(%arg0: i32, %arg1: i32, %arg2: i32) -> (i32, i32) {
    %c0_i32 = arith.constant 0 : i32
    return %arg0, %arg2 : i32, i32
  }
  func.func @transform_1(%arg0: i32, %arg1: i32, %arg2: i32) -> (i32, i32) {
    %c0_i32 = arith.constant 0 : i32
    return %arg2, %arg1 : i32, i32
  }
  func.func @transform_2(%arg0: i32, %arg1: i32, %arg2: i32) -> (i32, i32) {
    %c0_i32 = arith.constant 0 : i32
    %c0_i32_0 = arith.constant 0 : i32
    return %c0_i32, %arg1 : i32, i32
  }
  func.func @transform_3(%arg0: i32, %arg1: i32, %arg2: i32) -> (i32, i32) {
    %c0_i32 = arith.constant 0 : i32
    return %arg0, %arg1 : i32, i32
  }
}

</mosaic_0001>

<bundles_post_ra>
// kernel: tpu_custom_call.1
= control target key start
LH: loop header
LB: loop body
LE: loop exit
PB: predicated region body
PF: predicated region fallthrough
CT: control target
= control target key end

     0   :  { %8 = vsyncpa [#allocation4], 0  ;;  %s803_s0 = inlined_call_operand.hbm [shape: bf16[128,128], index: 0, kind: input, shape index: {}]   ;;  %s804_s1 = inlined_call_operand.hbm [shape: bf16[128,128], index: 1, kind: input, shape index: {}]   ;;  %s805_s2 = inlined_call_operand.vmem [shape: f32[1,128], index: 2, kind: input, shape index: {}]   ;;  %s806_s3 = inlined_call_operand.hbm [shape: bf16[128,128], index: 3, kind: output, shape index: {}]  }
   0x1   :  { %9 = vsyncpa [#allocation7], 0 }
   0x2   :  { %10 = vsyncpa [#allocation5], 0  ;;  %s730_s12 = smov [#allocation3]   ;;  %s658_s16 = scalar_lea.hbm %s803_s0, 1024 }
   0x3   :  { %s16_s13 = sshll.u32 %s730_s12, 4  ;;  %p659_p0 = scmp.ne.s32.totalorder %s803_s0, %s658_s16  ;;  %s17_s13 = int_to_ptr.vmem [resolvable:$true] %s16_s13 }
   0x4   :  { %p662_p1 = scmp.lt.u32.totalorder %s658_s16, %s803_s0 }
   0x6   :  { %p664_p2 = pnand %p662_p1, %p659_p0 }
   0x8   :  { %667 = shalt.err (!%p664_p2)
}
   0x9   :  { %s668_s21 = scalar_lea.vmem %s17_s13, 1024  ;;  %p673_p4 = scmp.lt.s32.totalorder %s17_s13, %s17_s13 }
   0xa   :  { %p669_p3 = scmp.ne.s32.totalorder %s17_s13, %s668_s21  ;;  %p674_p5 = scmp.lt.s32.totalorder %s668_s21, %s668_s21 }
   0xc   :  { %p675_p6 = por %p674_p5, %p673_p4 }
   0xe   :  { %p676_p7 = pnand %p675_p6, %p669_p3 }
  0x10   :  { %679 = shalt.err (!%p676_p7)
}
  0x11   :  { %s731_s22 = smov 64   ;;  %s732_s23 = smov 4  }
  0x12   :  { %22 = dma.hbm_to_vmem [thread:$0]  %s803_s0, 1024, %s17_s13, [#allocation4], %s731_s22, %s731_s22, %s732_s23  }
  0x13   :  { %s733_s26 = smov [#allocation6]   ;;  %s680_s30 = scalar_lea.hbm %s804_s1, 1024 }
  0x14   :  { %s28_s27 = sshll.u32 %s733_s26, 4  ;;  %p681_p8 = scmp.ne.s32.totalorder %s804_s1, %s680_s30  ;;  %s29_s27 = int_to_ptr.vmem [resolvable:$true] %s28_s27 }
  0x15   :  { %p684_p9 = scmp.lt.u32.totalorder %s680_s30, %s804_s1 }
  0x17   :  { %p686_p10 = pnand %p684_p9, %p681_p8 }
  0x19   :  { %689 = shalt.err (!%p686_p10)
}
  0x1a   :  { %s690_s8 = scalar_lea.vmem %s29_s27, 1024  ;;  %p695_p12 = scmp.lt.s32.totalorder %s29_s27, %s29_s27 }
  0x1b   :  { %p691_p11 = scmp.ne.s32.totalorder %s29_s27, %s690_s8  ;;  %p696_p13 = scmp.lt.s32.totalorder %s690_s8, %s690_s8 }
  0x1d   :  { %p697_p0 = por %p696_p13, %p695_p12 }
  0x1f   :  { %p698_p1 = pnand %p697_p0, %p691_p11 }
  0x21   :  { %701 = shalt.err (!%p698_p1)
}
  0x22   :  { %34 = dma.hbm_to_vmem [thread:$0]  %s804_s1, 1024, %s29_s27, [#allocation7], %s731_s22, %s731_s22, %s732_s23  }
  0x23   :  { %724 = dma.done.wait [#allocation4], 1024  }
  0x24   :  { %725 = vsyncadd [#allocation4], 4294966272 }
  0x25   :  { %726 = dma.done.wait [#allocation7], 1024  }
  0x26   :  { %727 = vsyncadd [#allocation7], 4294966272  ;;  %v642_v0 = vld [vmem:[#allocation6] sm:$0xff]   ;;  %v643_v1 = vld [vmem:[#allocation6 + $0x8] sm:$0xff]  }
  0x27   :  { %589 = vmatprep.subr.bf16.mxu0 %v642_v0  ;;  %621 = vmatprep.subr.bf16.mxu1 %v642_v0  ;;  %v644_v2 = vld [vmem:[#allocation6 + $0x10] sm:$0xff]   ;;  %v645_v3 = vld [vmem:[#allocation6 + $0x18] sm:$0xff]   ;;  %v650_v4 = vld [vmem:[#allocation3] sm:$0xff]  }
  0x28   :  { %590 = vmatpush3.bf16.msra.mxu0 %v642_v0  ;;  %629 = vmatpush3.bf16.msra.mxu1 %v642_v0  ;;  %v651_v5 = vld [vmem:[#allocation3 + $0x20] sm:$0xff]   ;;  %v647_v7 = vld [vmem:[#allocation6 + $0x28] sm:$0xff]   ;;  %v648_v8 = vld [vmem:[#allocation6 + $0x30] sm:$0xff]  }
  0x29   :  { %591 = vmatprep.subr.bf16.mxu0 %v643_v1  ;;  %622 = vmatprep.subr.bf16.mxu1 %v643_v1  ;;  %v646_v6 = vld [vmem:[#allocation6 + $0x20] sm:$0xff]   ;;  %v649_v9 = vld [vmem:[#allocation6 + $0x38] sm:$0xff]   ;;  %v652_v10 = vld [vmem:[#allocation3 + $0x8] sm:$0xff]  }
  0x2a   :  { %605 = vmatprep.mubr.bf16.mxu0 %v650_v4  ;;  %613 = vmatprep.mubr.bf16.mxu1 %v651_v5  ;;  %v653_v11 = vld [vmem:[#allocation3 + $0x28] sm:$0xff]   ;;  %v654_v12 = vld [vmem:[#allocation3 + $0x10] sm:$0xff]   ;;  %v656_v14 = vld [vmem:[#allocation3 + $0x18] sm:$0xff]  }
  0x2b   :  { %v655_v13 = vld [vmem:[#allocation3 + $0x30] sm:$0xff]   ;;  %v657_v15 = vld [vmem:[#allocation3 + $0x38] sm:$0xff]   ;;  %v493_v17 = vld [vmem:[%s805_s2] ss:$0 sm:$0xff]  ;;  %s734_s2 = smov [#allocation8]  }
  0x2c   :  { %592 = vmatpush3.bf16.msra.mxu0 %v643_v1  ;;  %630 = vmatpush3.bf16.msra.mxu1 %v643_v1  ;;  %s464_s11 = sshll.u32 %s734_s2, 4  ;;  %s465_s11 = int_to_ptr.vmem [resolvable:$true] %s464_s11 }
  0x2d   :  { %593 = vmatprep.subr.bf16.mxu0 %v644_v2  ;;  %623 = vmatprep.subr.bf16.mxu1 %v644_v2  ;;  %s702_s12 = scalar_lea.vmem %s465_s11, 1024  ;;  %p707_p3 = scmp.lt.s32.totalorder %s465_s11, %s465_s11 }
  0x2e   :  { %p703_p2 = scmp.ne.s32.totalorder %s465_s11, %s702_s12  ;;  %p708_p4 = scmp.lt.s32.totalorder %s702_s12, %s702_s12 }
  0x30   :  { %594 = vmatpush3.bf16.msra.mxu0 %v644_v2  ;;  %631 = vmatpush3.bf16.msra.mxu1 %v644_v2  ;;  %p709_p5 = por %p708_p4, %p707_p3 }
  0x31   :  { %595 = vmatprep.subr.bf16.mxu0 %v645_v3  ;;  %624 = vmatprep.subr.bf16.mxu1 %v645_v3 }
  0x32   :  { %p710_p6 = pnand %p709_p5, %p703_p2 }
  0x34   :  { %596 = vmatpush3.bf16.msra.mxu0 %v645_v3  ;;  %632 = vmatpush3.bf16.msra.mxu1 %v645_v3 }
  0x35   :  { %597 = vmatprep.subr.bf16.mxu0 %v646_v6  ;;  %625 = vmatprep.subr.bf16.mxu1 %v646_v6 }
  0x38   :  { %598 = vmatpush3.bf16.msra.mxu0 %v646_v6  ;;  %633 = vmatpush3.bf16.msra.mxu1 %v646_v6 }
  0x39   :  { %599 = vmatprep.subr.bf16.mxu0 %v647_v7  ;;  %626 = vmatprep.subr.bf16.mxu1 %v647_v7 }
  0x3c   :  { %600 = vmatpush3.bf16.msra.mxu0 %v647_v7  ;;  %634 = vmatpush3.bf16.msra.mxu1 %v647_v7 }
  0x3d   :  { %601 = vmatprep.subr.bf16.mxu0 %v648_v8  ;;  %627 = vmatprep.subr.bf16.mxu1 %v648_v8 }
  0x40   :  { %602 = vmatpush3.bf16.msra.mxu0 %v648_v8  ;;  %635 = vmatpush3.bf16.msra.mxu1 %v648_v8 }
  0x41   :  { %603 = vmatprep.subr.bf16.mxu0 %v649_v9  ;;  %628 = vmatprep.subr.bf16.mxu1 %v649_v9 }
  0x44   :  { %604 = vmatpush3.bf16.msra.mxu0 %v649_v9  ;;  %636 = vmatpush3.bf16.msra.mxu1 %v649_v9 }
  0x47   :  { %606 = vmatmul.mubr.bf16.vlgmr.msra.gmra.mrb[0].mxu0 %v652_v10  ;;  %614 = vmatmul.mubr.bf16.vlgmr.msra.gmra.mrb[0].mxu1 %v653_v11 }
  0x48   :  { %609 = vmatprep.mubr.bf16.mxu0 %v654_v12  ;;  %617 = vmatprep.mubr.bf16.mxu1 %v655_v13 }
  0x4f   :  { %610 = vmatmul.mubr.bf16.gmra.mrb[4].mxu0 %v656_v14  ;;  %618 = vmatmul.mubr.bf16.gmra.mrb[4].mxu1 %v657_v15 }
 0x11a   :  { %v607_v16 = vpop.f32.mrb[0].mxu0  ;;  %v615_v18 = vpop.f32.mrb[0].mxu1 }
 0x11b   :  { %v242_v19 = vpop.f32.mrb[1].mxu0  ;;  %v274_v20 = vpop.f32.mrb[1].mxu1  ;;  %v365_v23 = vadd.f32 %v607_v16, %v493_v17  ;;  %v373_v24 = vadd.f32 %v615_v18, %v493_v17 }
 0x11c   :  { %v608_v21 = vpop.f32.mrb[2].mxu0  ;;  %v616_v22 = vpop.f32.mrb[2].mxu1  ;;  %v363_v29 = vadd.f32 %v493_v17, %v242_v19  ;;  %v371_v30 = vadd.f32 %v493_v17, %v274_v20 }
 0x11d   :  { %v366_v25 = vadd.f32 %v608_v21, %v493_v17  ;;  %v374_v26 = vadd.f32 %v616_v22, %v493_v17  ;;  %v245_v27 = vpop.f32.mrb[3].mxu0  ;;  %v277_v28 = vpop.f32.mrb[3].mxu1 }
 0x11e   :  { %v364_v31 = vadd.f32 %v493_v17, %v245_v27  ;;  %v372_v32 = vadd.f32 %v493_v17, %v277_v28 }
 0x11f   :  { %v534_v33 = vpack.c.bf16 %v366_v25, %v365_v23  ;;  %v554_v34 = vpack.c.bf16 %v374_v26, %v373_v24 }
 0x120   :  { %v529_v35 = vpack.c.bf16 %v364_v31, %v363_v29  ;;  %v549_v36 = vpack.c.bf16 %v372_v32, %v371_v30 }
 0x121   :  { %566 = vst [vmem:[#allocation8 + $0x8] sm:$0xff] %v534_v33   ;;  %570 = vst [vmem:[#allocation8 + $0x28] sm:$0xff] %v554_v34  }
 0x122   :  { %530 = vst [vmem:[#allocation8] sm:$0xff] %v529_v35   ;;  %569 = vst [vmem:[#allocation8 + $0x20] sm:$0xff] %v549_v36   ;;  %v611_v37 = vpop.f32.mrb[4].mxu0  ;;  %v619_v38 = vpop.f32.mrb[4].mxu1 }
 0x123   :  { %v258_v39 = vpop.f32.mrb[5].mxu0  ;;  %v290_v40 = vpop.f32.mrb[5].mxu1  ;;  %v369_v43 = vadd.f32 %v611_v37, %v493_v17  ;;  %v377_v44 = vadd.f32 %v619_v38, %v493_v17 }
 0x124   :  { %v612_v41 = vpop.f32.mrb[6].mxu0  ;;  %v620_v42 = vpop.f32.mrb[6].mxu1  ;;  %v367_v49 = vadd.f32 %v493_v17, %v258_v39  ;;  %v375_v50 = vadd.f32 %v493_v17, %v290_v40 }
 0x125   :  { %v370_v45 = vadd.f32 %v612_v41, %v493_v17  ;;  %v378_v46 = vadd.f32 %v620_v42, %v493_v17  ;;  %v261_v47 = vpop.f32.mrb[7].mxu0  ;;  %v293_v48 = vpop.f32.mrb[7].mxu1 }
 0x126   :  { %v368_v51 = vadd.f32 %v493_v17, %v261_v47  ;;  %v376_v52 = vadd.f32 %v493_v17, %v293_v48 }
 0x127   :  { %v544_v53 = vpack.c.bf16 %v370_v45, %v369_v43  ;;  %v564_v54 = vpack.c.bf16 %v378_v46, %v377_v44 }
 0x128   :  { %v539_v55 = vpack.c.bf16 %v368_v51, %v367_v49  ;;  %v559_v56 = vpack.c.bf16 %v376_v52, %v375_v50 }
 0x129   :  { %568 = vst [vmem:[#allocation8 + $0x18] sm:$0xff] %v544_v53   ;;  %572 = vst [vmem:[#allocation8 + $0x38] sm:$0xff] %v564_v54  }
 0x12a   :  { %567 = vst [vmem:[#allocation8 + $0x10] sm:$0xff] %v539_v55   ;;  %571 = vst [vmem:[#allocation8 + $0x30] sm:$0xff] %v559_v56  }
 0x12b   :  { %713 = shalt.err (!%p710_p6)
}
 0x12c   :  { %s714_s15 = scalar_lea.hbm %s806_s3, 1024 }
 0x12d   :  { %p715_p7 = scmp.ne.s32.totalorder %s806_s3, %s714_s15  ;;  %p718_p8 = scmp.lt.u32.totalorder %s714_s15, %s806_s3 }
 0x12f   :  { %p720_p9 = pnand %p718_p8, %p715_p7 }
 0x131   :  { %723 = shalt.err (!%p720_p9)
}
 0x132   :  { %470 = dma.vmem_to_hbm [thread:$0]  %s465_s11, 1024, %s806_s3, [#allocation5], %s731_s22, %s731_s22, %s732_s23  }
 0x133   :  { %728 = dma.done.wait [#allocation5], 1024  }
 0x134   :  { %729 = vsyncadd [#allocation5], 4294966272 }
 0x135   :  { %474 = vsyncpa [#allocation4], 1 }
 0x136   :  { %475 = vsyncpa [#allocation7], 1 }
 0x137   :  { %476 = vsyncpa [#allocation5], 1 }

</bundles_post_ra>
